<compile_context>
chip_gen: v5e
topology: v5e:2x2
jax: 0.10.0
libtpu: 0.0.40
codegen_flags: <defaults>
</compile_context>

<pallas_src>
import jax
import jax.numpy as jnp
from jax.experimental import pallas as pl
from jax.experimental.pallas import tpu as pltpu


def _round_up(n, m):
    return ((n + m - 1) // m) * m


def _cdiv(a, b):
    return -(-a // b)


def _lane_pad(n):
    # 256-align big (potentially MXU-bound) dims for full 2x256x256 MXU
    # occupancy on v6e/v7x; 128 is enough for small, memory-bound dims
    # (and for v5e's 128x128 MXUs).
    return _round_up(n, 256 if n >= 512 else 128)


def _pick_batch_tile(B, tb_max=512):
    # >= 2 grid steps so dimension_semantics=("parallel",) can shard across the
    # two v7x TensorCores; <= tb_max rows per step (big steps amortize the
    # ~0.35us/step overhead on v5e/v6e); 16-aligned for bf16 sublane packing;
    # batch padding bounded by ~16 * n_steps rows.
    n_steps = max(2, _cdiv(B, tb_max))
    return max(16, _round_up(_cdiv(B, n_steps), 16))


def _local_net_kernel(x_ref, w1_ref, b1_ref, w2_ref, b2_ref, o_ref):
    """out = relu(x @ W1 + b1) @ W2 + b2 for one batch tile.

    x arrives f32 (unpadded feature width) and is cast to bf16 in-register;
    both matmuls accumulate in f32 on the MXU; bias + ReLU epilogue runs in
    f32 on the VPU; the hidden activation is downcast to bf16 before the
    second MXU pass; the store is bf16 and lane-dense.
    """
    x = x_ref[...].astype(jnp.bfloat16)
    h = jnp.dot(x, w1_ref[...], preferred_element_type=jnp.float32)
    h = jnp.maximum(h + b1_ref[...], 0.0)          # (TB, Hp) + (1, Hp), f32
    h = h.astype(jnp.bfloat16)
    o = jnp.dot(h, w2_ref[...], preferred_element_type=jnp.float32)
    o_ref[...] = (o + b2_ref[...]).astype(o_ref.dtype)


def local_wrapper_forward(x, w1, b1, w2, b2, *, tb=None, trim=False):
    """JAX-side mirror of LocalWrapper.forward: x = self.local_net(x).

    Returns a bf16 activation slab with H/D_out lane-padded to 128/256 (the
    padding columns are exact zeros) so the next pipeline shard can consume it
    without an extra HBM slice pass; pass trim=True to get the (B, D_out)
    logical view (materializes one extra copy).
    """
    B, D_in = x.shape
    H = w1.shape[1]
    D_out = w2.shape[1]

    H_p = _lane_pad(H)
    D_out_p = _lane_pad(D_out)

    if tb is None:
        tb = _pick_batch_tile(B)
    else:
        tb = max(16, _round_up(min(tb, _round_up(B, 16)), 16))
    Bp = _round_up(B, tb)

    resident_weight_bytes = (D_in * H_p + H_p * D_out_p) * 2
    if resident_weight_bytes > 32 << 20:
        # TODO(synk): add a K/N-tiled 3-D grid path (f32 VMEM accumulator,
        # pl.when init/finalize) for shards whose weights cannot stay
        # VMEM-resident; not needed at this shard size.
        raise NotImplementedError("weights too large for VMEM-resident path")

    # x stays f32 and unpadded in the feature dim (cast to bf16 in-kernel);
    # only pad the batch if the tile does not divide it (usually zero rows).
    xp = x if Bp == B else jnp.pad(x, ((0, Bp - B), (0, 0)))
    # Weights/biases: one-time lane padding + bf16 cast (in a real pipeline
    # shard these would be stored pre-padded).
    w1b = jnp.pad(w1, ((0, 0), (0, H_p - H))).astype(jnp.bfloat16)
    w2b = jnp.pad(w2, ((0, H_p - H), (0, D_out_p - D_out))).astype(jnp.bfloat16)
    b1p = jnp.pad(b1.reshape(1, H), ((0, 0), (0, H_p - H))).astype(jnp.float32)
    b2p = jnp.pad(b2.reshape(1, D_out), ((0, 0), (0, D_out_p - D_out))).astype(jnp.float32)

    grid = (Bp // tb,)

    flops = 2 * Bp * (D_in * H_p + H_p * D_out_p)
    bytes_accessed = (
        Bp * D_in * 4                                   # f32 activation in
        + (w1b.size + w2b.size) * 2                     # bf16 weights
        + (b1p.size + b2p.size) * 4                     # f32 biases
        + Bp * D_out_p * 2                              # bf16 activation out
    )

    def _run(single_buffer_weights):
        # Constant index_map => the weights/biases never change block; request
        # single buffering so they don't eat 2x VMEM (matters on v7x, 64 MiB).
        wkw = dict(pipeline_mode=pl.Buffered(1)) if single_buffer_weights else {}
        wbuf = 1 if single_buffer_weights else 2

        vmem_bytes = (
            2 * tb * D_in * 4                            # double-buffered x tiles
            + 2 * tb * D_out_p * 2                       # double-buffered out tiles
            + wbuf * (D_in * H_p * 2 + H_p * D_out_p * 2
                      + (H_p + D_out_p) * 4)             # resident weights/biases
            + tb * H_p * 6 + tb * D_out_p * 4            # in-kernel intermediates
        )
        vmem_limit = max(4 << 20, min(int(vmem_bytes * 1.5), 48 << 20))

        return pl.pallas_call(
            _local_net_kernel,
            out_shape=jax.ShapeDtypeStruct((Bp, D_out_p), jnp.bfloat16),
            grid_spec=pl.GridSpec(
                grid=grid,
                in_specs=[
                    pl.BlockSpec((tb, D_in), lambda i: (i, 0)),           # x: batch-tiled, f32
                    pl.BlockSpec((D_in, H_p), lambda i: (0, 0), **wkw),   # W1: resident
                    pl.BlockSpec((1, H_p), lambda i: (0, 0), **wkw),      # b1: resident
                    pl.BlockSpec((H_p, D_out_p), lambda i: (0, 0), **wkw),# W2: resident
                    pl.BlockSpec((1, D_out_p), lambda i: (0, 0), **wkw),  # b2: resident
                ],
                out_specs=pl.BlockSpec((tb, D_out_p), lambda i: (i, 0)),
            ),
            compiler_params=pltpu.CompilerParams(
                dimension_semantics=("parallel",),    # >=2 steps -> both v7x TCs
                vmem_limit_bytes=vmem_limit,
            ),
            cost_estimate=pl.CostEstimate(
                flops=flops, transcendentals=0, bytes_accessed=bytes_accessed),
        )(xp, w1b, b1p, w2b, b2p)

    try:
        out_p = _run(single_buffer_weights=True)
    except Exception:
        # pipeline_mode=pl.Buffered(1) not supported by this jax version;
        # fall back to default (double-buffered) resident weights.
        out_p = _run(single_buffer_weights=False)

    # TODO(synk): next_shard.remote().forward(x) (torch.distributed.rpc hop to
    # another worker), the threading lock, train() propagation and
    # parameter_rrefs() have no on-device Pallas equivalent; this returns the
    # local shard's activation, i.e. the `next_shard is None` branch.
    if trim:
        return out_p[:B, :D_out]
    return out_p


if __name__ == "__main__":
    key = jax.random.PRNGKey(0)
    kx, kw1, kb1, kw2, kb2 = jax.random.split(key, 5)

    # Small, deliberately non-128-aligned shapes to exercise the padding path;
    # B=384 -> tb=192, zero batch padding, 2-step "parallel" grid.
    B, D_in, H, D_out = 384, 32, 64, 48

    x = jax.random.normal(kx, (B, D_in), dtype=jnp.float32)
    w1 = jax.random.normal(kw1, (D_in, H), dtype=jnp.float32) * 0.1
    b1 = jax.random.normal(kb1, (H,), dtype=jnp.float32) * 0.1
    w2 = jax.random.normal(kw2, (H, D_out), dtype=jnp.float32) * 0.1
    b2 = jax.random.normal(kb2, (D_out,), dtype=jnp.float32) * 0.1

    out_p = local_wrapper_forward(x, w1, b1, w2, b2)
    out_p = jax.block_until_ready(out_p)

    D_out_p = _lane_pad(D_out)
    assert out_p.shape == (B, D_out_p) and out_p.dtype == jnp.bfloat16
    # Lane-padding columns of the returned slab are exact zeros.
    assert jnp.all(out_p[:, D_out:] == 0)

    out = out_p[:B, :D_out].astype(jnp.float32)   # test-only trim for comparison

    # Reference with the same bf16 casts (isolates MXU-vs-XLA differences).
    xb = x.astype(jnp.bfloat16)
    w1b = w1.astype(jnp.bfloat16)
    w2b = w2.astype(jnp.bfloat16)
    h_ref = jnp.maximum(jnp.dot(xb, w1b, preferred_element_type=jnp.float32) + b1, 0.0)
    ref_bf16 = jnp.dot(h_ref.astype(jnp.bfloat16), w2b,
                       preferred_element_type=jnp.float32) + b2
    assert jnp.allclose(out, ref_bf16, atol=2e-2, rtol=2e-2)

    # Loose check against the pure-f32 PyTorch-style reference.
    ref_f32 = jnp.maximum(x @ w1 + b1, 0.0) @ w2 + b2
    assert jnp.allclose(out, ref_f32, atol=1e-1, rtol=1e-1)

    print("KERNEL_OK")
</pallas_src>

<mosaic_0001>
module attributes {stable_mosaic.version = 11 : i64} {
  func.func @_local_net_kernel(%arg0: i32, %arg1: memref<192x32xf32, #tpu.memory_space<vmem>>, %arg2: memref<32x128xbf16, #tpu.memory_space<vmem>>, %arg3: memref<1x128xf32, #tpu.memory_space<vmem>>, %arg4: memref<128x128xbf16, #tpu.memory_space<vmem>>, %arg5: memref<1x128xf32, #tpu.memory_space<vmem>>, %arg6: memref<192x128xbf16, #tpu.memory_space<vmem>>) attributes {dimension_semantics = [#tpu.dimension_semantics<parallel>], iteration_bounds = array<i64: 2>, scalar_prefetch = 0 : i64, scratch_operands = 0 : i64, tpu.core_type = #tpu.core_type<tc>, window_params = [{transform_indices = @transform_0, window_bounds = array<i64: 192, 32>}, {pipeline_mode = #tpu.pipeline_mode<synchronous>, transform_indices = @transform_1, window_bounds = array<i64: 32, 128>}, {pipeline_mode = #tpu.pipeline_mode<synchronous>, transform_indices = @transform_2, window_bounds = array<i64: 1, 128>}, {pipeline_mode = #tpu.pipeline_mode<synchronous>, transform_indices = @transform_3, window_bounds = array<i64: 128, 128>}, {pipeline_mode = #tpu.pipeline_mode<synchronous>, transform_indices = @transform_4, window_bounds = array<i64: 1, 128>}, {transform_indices = @transform_5, window_bounds = array<i64: 192, 128>}]} {
    %c0 = arith.constant 0 : index
    %c0_0 = arith.constant 0 : index
    %0 = vector.load %arg1[%c0, %c0_0] : memref<192x32xf32, #tpu.memory_space<vmem>>, vector<192x32xf32>
    %1 = arith.truncf %0 : vector<192x32xf32> to vector<192x32xbf16>
    %c0_1 = arith.constant 0 : index
    %c0_2 = arith.constant 0 : index
    %2 = vector.load %arg2[%c0_1, %c0_2] : memref<32x128xbf16, #tpu.memory_space<vmem>>, vector<32x128xbf16>
    %cst = arith.constant dense<0.000000e+00> : vector<192x128xf32>
    %3 = tpu.matmul %1, %2, %cst {dimension_numbers = #tpu.dot_dimension_numbers<[1], [0], [0], [1], [0, 0, 1, 1], [], []>} : vector<192x32xbf16>, vector<32x128xbf16>, vector<192x128xf32> -> vector<192x128xf32>
    %c0_3 = arith.constant 0 : index
    %c0_4 = arith.constant 0 : index
    %4 = vector.load %arg3[%c0_3, %c0_4] : memref<1x128xf32, #tpu.memory_space<vmem>>, vector<1x128xf32>
    %5 = vector.broadcast %4 : vector<1x128xf32> to vector<192x128xf32>
    %6 = arith.addf %3, %5 : vector<192x128xf32>
    %cst_5 = arith.constant 0.000000e+00 : f32
    %7 = vector.broadcast %cst_5 : f32 to vector<192x128xf32>
    %8 = arith.maximumf %6, %7 : vector<192x128xf32>
    %9 = arith.truncf %8 : vector<192x128xf32> to vector<192x128xbf16>
    %c0_6 = arith.constant 0 : index
    %c0_7 = arith.constant 0 : index
    %10 = vector.load %arg4[%c0_6, %c0_7] : memref<128x128xbf16, #tpu.memory_space<vmem>>, vector<128x128xbf16>
    %cst_8 = arith.constant dense<0.000000e+00> : vector<192x128xf32>
    %11 = tpu.matmul %9, %10, %cst_8 {dimension_numbers = #tpu.dot_dimension_numbers<[1], [0], [0], [1], [0, 0, 1, 1], [], []>} : vector<192x128xbf16>, vector<128x128xbf16>, vector<192x128xf32> -> vector<192x128xf32>
    %c0_9 = arith.constant 0 : index
    %c0_10 = arith.constant 0 : index
    %12 = vector.load %arg5[%c0_9, %c0_10] : memref<1x128xf32, #tpu.memory_space<vmem>>, vector<1x128xf32>
    %13 = vector.broadcast %12 : vector<1x128xf32> to vector<192x128xf32>
    %14 = arith.addf %11, %13 : vector<192x128xf32>
    %15 = arith.truncf %14 : vector<192x128xf32> to vector<192x128xbf16>
    %c0_11 = arith.constant 0 : index
    %c0_12 = arith.constant 0 : index
    %16 = vector.load %arg6[%c0_11, %c0_12] : memref<192x128xbf16, #tpu.memory_space<vmem>>, vector<192x128xbf16>
    tpu.vector_store %arg6[%c0_11, %c0_12], %15 {strides = array<i32>} : memref<192x128xbf16, #tpu.memory_space<vmem>>, vector<192x128xbf16>,
    return
  }
  func.func @transform_0(%arg0: i32) -> (i32, i32) {
    %c0_i32 = arith.constant 0 : i32
    %c0_i32_0 = arith.constant 0 : i32
    return %arg0, %c0_i32 : i32, i32
  }
  func.func @transform_1(%arg0: i32) -> (i32, i32) {
    %c0_i32 = arith.constant 0 : i32
    %c0_i32_0 = arith.constant 0 : i32
    %c0_i32_1 = arith.constant 0 : i32
    return %c0_i32, %c0_i32_0 : i32, i32
  }
  func.func @transform_2(%arg0: i32) -> (i32, i32) {
    %c0_i32 = arith.constant 0 : i32
    %c0_i32_0 = arith.constant 0 : i32
    %c0_i32_1 = arith.constant 0 : i32
    return %c0_i32, %c0_i32_0 : i32, i32
  }
  func.func @transform_3(%arg0: i32) -> (i32, i32) {
    %c0_i32 = arith.constant 0 : i32
    %c0_i32_0 = arith.constant 0 : i32
    %c0_i32_1 = arith.constant 0 : i32
    return %c0_i32, %c0_i32_0 : i32, i32
  }
  func.func @transform_4(%arg0: i32) -> (i32, i32) {
    %c0_i32 = arith.constant 0 : i32
    %c0_i32_0 = arith.constant 0 : i32
    %c0_i32_1 = arith.constant 0 : i32
    return %c0_i32, %c0_i32_0 : i32, i32
  }
  func.func @transform_5(%arg0: i32) -> (i32, i32) {
    %c0_i32 = arith.constant 0 : i32
    %c0_i32_0 = arith.constant 0 : i32
    return %arg0, %c0_i32 : i32, i32
  }
}

module attributes {stable_mosaic.version = 11 : i64} {
  func.func @_local_net_kernel(%arg0: i32, %arg1: memref<192x32xf32, #tpu.memory_space<vmem>>, %arg2: memref<32x128xbf16, #tpu.memory_space<vmem>>, %arg3: memref<1x128xf32, #tpu.memory_space<vmem>>, %arg4: memref<128x128xbf16, #tpu.memory_space<vmem>>, %arg5: memref<1x128xf32, #tpu.memory_space<vmem>>, %arg6: memref<192x128xbf16, #tpu.memory_space<vmem>>) attributes {dimension_semantics = [#tpu.dimension_semantics<parallel>], iteration_bounds = array<i64: 2>, scalar_prefetch = 0 : i64, scratch_operands = 0 : i64, tpu.core_type = #tpu.core_type<tc>, window_params = [{transform_indices = @transform_0, window_bounds = array<i64: 192, 32>}, {pipeline_mode = #tpu.pipeline_mode<synchronous>, transform_indices = @transform_1, window_bounds = array<i64: 32, 128>}, {pipeline_mode = #tpu.pipeline_mode<synchronous>, transform_indices = @transform_2, window_bounds = array<i64: 1, 128>}, {pipeline_mode = #tpu.pipeline_mode<synchronous>, transform_indices = @transform_3, window_bounds = array<i64: 128, 128>}, {pipeline_mode = #tpu.pipeline_mode<synchronous>, transform_indices = @transform_4, window_bounds = array<i64: 1, 128>}, {transform_indices = @transform_5, window_bounds = array<i64: 192, 128>}]} {
    %c0 = arith.constant 0 : index
    %c0_0 = arith.constant 0 : index
    %0 = vector.load %arg1[%c0, %c0_0] : memref<192x32xf32, #tpu.memory_space<vmem>>, vector<192x32xf32>
    %1 = arith.truncf %0 : vector<192x32xf32> to vector<192x32xbf16>
    %c0_1 = arith.constant 0 : index
    %c0_2 = arith.constant 0 : index
    %2 = vector.load %arg2[%c0_1, %c0_2] : memref<32x128xbf16, #tpu.memory_space<vmem>>, vector<32x128xbf16>
    %cst = arith.constant dense<0.000000e+00> : vector<192x128xf32>
    %3 = tpu.matmul %1, %2, %cst {dimension_numbers = #tpu.dot_dimension_numbers<[1], [0], [0], [1], [0, 0, 1, 1], [], []>} : vector<192x32xbf16>, vector<32x128xbf16>, vector<192x128xf32> -> vector<192x128xf32>
    %c0_3 = arith.constant 0 : index
    %c0_4 = arith.constant 0 : index
    %4 = vector.load %arg3[%c0_3, %c0_4] : memref<1x128xf32, #tpu.memory_space<vmem>>, vector<1x128xf32>
    %5 = vector.broadcast %4 : vector<1x128xf32> to vector<192x128xf32>
    %6 = arith.addf %3, %5 : vector<192x128xf32>
    %cst_5 = arith.constant 0.000000e+00 : f32
    %7 = vector.broadcast %cst_5 : f32 to vector<192x128xf32>
    %8 = arith.maximumf %6, %7 : vector<192x128xf32>
    %9 = arith.truncf %8 : vector<192x128xf32> to vector<192x128xbf16>
    %c0_6 = arith.constant 0 : index
    %c0_7 = arith.constant 0 : index
    %10 = vector.load %arg4[%c0_6, %c0_7] : memref<128x128xbf16, #tpu.memory_space<vmem>>, vector<128x128xbf16>
    %cst_8 = arith.constant dense<0.000000e+00> : vector<192x128xf32>
    %11 = tpu.matmul %9, %10, %cst_8 {dimension_numbers = #tpu.dot_dimension_numbers<[1], [0], [0], [1], [0, 0, 1, 1], [], []>} : vector<192x128xbf16>, vector<128x128xbf16>, vector<192x128xf32> -> vector<192x128xf32>
    %c0_9 = arith.constant 0 : index
    %c0_10 = arith.constant 0 : index
    %12 = vector.load %arg5[%c0_9, %c0_10] : memref<1x128xf32, #tpu.memory_space<vmem>>, vector<1x128xf32>
    %13 = vector.broadcast %12 : vector<1x128xf32> to vector<192x128xf32>
    %14 = arith.addf %11, %13 : vector<192x128xf32>
    %15 = arith.truncf %14 : vector<192x128xf32> to vector<192x128xbf16>
    %c0_11 = arith.constant 0 : index
    %c0_12 = arith.constant 0 : index
    %16 = vector.load %arg6[%c0_11, %c0_12] : memref<192x128xbf16, #tpu.memory_space<vmem>>, vector<192x128xbf16>
    tpu.vector_store %arg6[%c0_11, %c0_12], %15 {strides = array<i32>} : memref<192x128xbf16, #tpu.memory_space<vmem>>, vector<192x128xbf16>,
    return
  }
  func.func @transform_0(%arg0: i32) -> (i32, i32) {
    %c0_i32 = arith.constant 0 : i32
    %c0_i32_0 = arith.constant 0 : i32
    return %arg0, %c0_i32 : i32, i32
  }
  func.func @transform_1(%arg0: i32) -> (i32, i32) {
    %c0_i32 = arith.constant 0 : i32
    %c0_i32_0 = arith.constant 0 : i32
    %c0_i32_1 = arith.constant 0 : i32
    return %c0_i32, %c0_i32_0 : i32, i32
  }
  func.func @transform_2(%arg0: i32) -> (i32, i32) {
    %c0_i32 = arith.constant 0 : i32
    %c0_i32_0 = arith.constant 0 : i32
    %c0_i32_1 = arith.constant 0 : i32
    return %c0_i32, %c0_i32_0 : i32, i32
  }
  func.func @transform_3(%arg0: i32) -> (i32, i32) {
    %c0_i32 = arith.constant 0 : i32
    %c0_i32_0 = arith.constant 0 : i32
    %c0_i32_1 = arith.constant 0 : i32
    return %c0_i32, %c0_i32_0 : i32, i32
  }
  func.func @transform_4(%arg0: i32) -> (i32, i32) {
    %c0_i32 = arith.constant 0 : i32
    %c0_i32_0 = arith.constant 0 : i32
    %c0_i32_1 = arith.constant 0 : i32
    return %c0_i32, %c0_i32_0 : i32, i32
  }
  func.func @transform_5(%arg0: i32) -> (i32, i32) {
    %c0_i32 = arith.constant 0 : i32
    %c0_i32_0 = arith.constant 0 : i32
    return %arg0, %c0_i32 : i32, i32
  }
}

</mosaic_0001>

<bundles_post_ra>
// kernel: tpu_custom_call.1
= control target key start
LH: loop header
LB: loop body
LE: loop exit
PB: predicated region body
PF: predicated region fallthrough
CT: control target
= control target key end

     0   :  { %10 = vsyncpa [#allocation3], 0  ;;  %s1209_s0 = inlined_call_operand.vmem [shape: f32[384,32], index: 0, kind: input, shape index: {}]   ;;  %s1210_s1 = inlined_call_operand.vmem [shape: bf16[32,128], index: 1, kind: input, shape index: {}]   ;;  %s1211_s2 = inlined_call_operand.vmem [shape: f32[1,128], index: 2, kind: input, shape index: {}]   ;;  %s1212_s3 = inlined_call_operand.vmem [shape: bf16[128,128], index: 3, kind: input, shape index: {}]   ;;  %s1213_s4 = inlined_call_operand.vmem [shape: f32[1,128], index: 4, kind: input, shape index: {}]   ;;  %s1214_s5 = inlined_call_operand.hbm [shape: bf16[384,128], index: 5, kind: output, shape index: {}]  }
   0x1   :  { %12 = vsyncpa [#allocation3 + $0x1], 0  ;;  %s980_s18 = smov 0   ;;  %s982_s19 = smov 0  }
   0x2   :  { %s984_s20 = smov 0   ;;  %s986_s21 = smov 0  }
   0x3 LB: > { %s1001_s22 = sadd.s32 4294967295, %s946_s21   ;;  %s688_s23 = sadd.s32 4294967294, %s946_s21   ;;  %s946_s21 = sphi %s986_s21, %s1220_s21   ;;  %s942_s20 = sphi %s984_s20, %s1219_s20   ;;  %s938_s19 = sphi %s982_s19, %s1218_s19   ;;  %s934_s18 = sphi %s980_s18, %s1217_s18  }
   0x4   : > { %s1005_s24 = sadd.s32 1, %s946_s21   ;;  %s135_s25 = sadd.s32 1, %s942_s20 }
   0x5   : > { %s132_s26 = ssub.s32 %s946_s21, %s1005_s24  ;;  %p145_p0 = scmp.ne.s32.totalorder %s942_s20, %s938_s19 }
   0x6   : > { %p133_p1 = scmp.eq.s32.totalorder %s132_s26, 0  ;;  %p146_p2 = scmp.eq.s32.totalorder %s1001_s22, 1 }
   0x7   : > { %p151_p3 = scmp.ne.s32.totalorder %s938_s19, %s934_s18  ;;  %p152_p4 = scmp.eq.s32.totalorder %s688_s23, 1 }
   0x8   : > { %s1016_s27 = scalar_select %p133_p1, %s942_s20, %s135_s25  }
   0x9   : > { %p1018_p5 = por %p146_p2, %p145_p0  ;;  %p1022_p6 = por %p152_p4, %p151_p3 }
   0xa   : > { %p691_p7 = scmp.ge.s32.totalorder %s946_s21, 1  ;;  %p191_p8 = scmp.lt.s32.totalorder %s946_s21, 3 }
   0xc   : > { %p192_p9 = pnand %p691_p7, %p191_p8 }
   0xd   : > { %s219_s7 = smul.u32 (!%p192_p9), 24, %s1001_s22  ;;  %s904_s16 = scalar_lea.hbm (!%p192_p9), %s1214_s5, 192 }
   0xe   : > { %195 = sbr.rel (%p192_p9) target bundleno = 491 (0x1eb), region = 40 }
   0xf   : > { %p220_p10 = scmp.lt.s32.totalorder (!%p192_p9), %s219_s7, 47  ;;  %s758_s30 = smul.u32 (!%p192_p9), 96, %s1001_s22 }
  0x11   : > { %s622_s8 = scalar_lea.hbm (!%p192_p9), %s1214_s5, %s758_s30 }
  0x13   : > { %v749_v0 = vld [vmem:[%s1210_s1 + $0x8] sm:$0xff]  ;;  %v748_v1 = vld [vmem:[%s1210_s1] sm:$0xff]  ;;  %s1222_s7 = smov (!%p220_p10, %s219_s7), 47  ;;  %vm283_vm0 = vcmask 261120   ;;  %v757_v20 = vld [vmem:[%s1212_s3 + $0x38] sm:$0xff] }
  0x14   : > { %326 = vmatpush.bf16.msra.mxu0 %v749_v0  ;;  %830 = vmatpush.bf16.msra.mxu3 %v749_v0  ;;  %s692_s10 = sshll.u32 %s1222_s7, 3  ;;  %v756_v21 = vld [vmem:[%s1212_s3 + $0x30] sm:$0xff]  ;;  %v755_v22 = vld [vmem:[%s1212_s3 + $0x28] sm:$0xff]  ;;  %v754_v25 = vld [vmem:[%s1212_s3 + $0x20] sm:$0xff] }
  0x15   : > { %s1038_s13 = scalar_lea.vmem %s1209_s0, %s692_s10  ;;  %493 = vmatpush.bf16.msra.mxu1 %v757_v20  ;;  %832 = vmatpush.bf16.msra.mxu2 %v757_v20  ;;  %v753_v32 = vld [vmem:[%s1212_s3 + $0x18] sm:$0xff]  ;;  %v752_v34 = vld [vmem:[%s1212_s3 + $0x10] sm:$0xff]  ;;  %v751_v38 = vld [vmem:[%s1212_s3 + $0x8] sm:$0xff]  ;;  %s625_s10 = sshll.u32 %s622_s8, 4  ;;  %s626_s10 = int_to_ptr.hbm [resolvable:$true] %s625_s10 }
  0x16   : > { %v227_v2 = vld [vmem:[%s1038_s13] sm:$0xff]  ;;  %v228_v3 = vld [vmem:[%s1038_s13 + $0x8] sm:$0xff]  ;;  %v229_v5 = vld [vmem:[%s1038_s13 + $0x10] sm:$0xff]  ;;  %s898_s12 = sshra.s32 %s626_s10, 4  ;;  %s899_s12 = int_to_ptr.hbm [resolvable:$true] %s898_s12 }
  0x17   : > { %v251_v4 = vpack.c.bf16 %v228_v3, %v227_v2  ;;  %v230_v6 = vld [vmem:[%s1038_s13 + $0x18] sm:$0xff]  ;;  %v231_v8 = vld [vmem:[%s1038_s13 + $0x20] sm:$0xff]  ;;  %v232_v9 = vld [vmem:[%s1038_s13 + $0x28] sm:$0xff]  ;;  %s900_s22 = scalar_lea.hbm %s899_s12, 96  ;;  %p905_p0 = scmp.lt.s32.totalorder %s899_s12, %s1214_s5 }
  0x18   : > { %327 = vmatpush.bf16.msra.mxu0 %v748_v1  ;;  %831 = vmatpush.bf16.msra.mxu3 %v748_v1  ;;  %v252_v7 = vpack.c.bf16 %v230_v6, %v229_v5  ;;  %v253_v10 = vpack.c.bf16 %v232_v9, %v231_v8  ;;  %v233_v11 = vld [vmem:[%s1038_s13 + $0x30] sm:$0xff]  ;;  %v234_v12 = vld [vmem:[%s1038_s13 + $0x38] sm:$0xff]  ;;  %v235_v14 = vld [vmem:[%s1038_s13 + $0x40] sm:$0xff]  ;;  %p901_p11 = scmp.ne.s32.totalorder %s899_s12, %s900_s22  ;;  %p906_p1 = scmp.lt.s32.totalorder %s904_s16, %s900_s22 }
  0x19   : > { %v254_v13 = vpack.c.bf16 %v234_v12, %v233_v11  ;;  %v236_v15 = vld [vmem:[%s1038_s13 + $0x48] sm:$0xff]  ;;  %v241_v17 = vld [vmem:[%s1038_s13 + $0x70] sm:$0xff]  ;;  %v242_v18 = vld [vmem:[%s1038_s13 + $0x78] sm:$0xff]  ;;  %494 = vmatpush.bf16.msra.mxu1 %v756_v21  ;;  %833 = vmatpush.bf16.msra.mxu2 %v756_v21 }
  0x1a   : > { %v255_v16 = vpack.c.bf16 %v236_v15, %v235_v14  ;;  %v258_v19 = vpack.c.bf16 %v242_v18, %v241_v17  ;;  %v237_v23 = vld [vmem:[%s1038_s13 + $0x50] sm:$0xff]  ;;  %v238_v24 = vld [vmem:[%s1038_s13 + $0x58] sm:$0xff]  ;;  %v243_v26 = vld [vmem:[%s1038_s13 + $0x80] sm:$0xff]  ;;  %p902_p12 = pnand %p901_p11, %p1018_p5  ;;  %p907_p2 = por %p906_p1, %p905_p0 }
  0x1b   : > { %701 = vmatmul.msk.bf16.vlgmr.msra.gmra.mxu0 %vm283_vm0, %v251_v4  ;;  %v244_v27 = vld [vmem:[%s1038_s13 + $0x88] sm:$0xff]  ;;  %v256_v28 = vpack.c.bf16 %v238_v24, %v237_v23  ;;  %v239_v30 = vld [vmem:[%s1038_s13 + $0x60] sm:$0xff]  ;;  %v245_v35 = vld [vmem:[%s1038_s13 + $0x90] sm:$0xff] }
  0x1c   : > { %708 = vmatmul.msk.bf16.vlgmr.msra.gmra.mxu3 %vm283_vm0, %v258_v19  ;;  %v259_v29 = vpack.c.bf16 %v244_v27, %v243_v26  ;;  %v240_v31 = vld [vmem:[%s1038_s13 + $0x68] sm:$0xff]  ;;  %v246_v36 = vld [vmem:[%s1038_s13 + $0x98] sm:$0xff]  ;;  %v750_v39 = vld [vmem:[%s1212_s3] sm:$0xff]  ;;  %p903_p13 = pneg %p902_p12 }
  0x1d   : > { %495 = vmatpush.bf16.msra.mxu1 %v755_v22  ;;  %834 = vmatpush.bf16.msra.mxu2 %v755_v22  ;;  %v257_v33 = vpack.c.bf16 %v240_v31, %v239_v30  ;;  %v260_v37 = vpack.c.bf16 %v246_v36, %v245_v35  ;;  %v247_v40 = vld [vmem:[%s1038_s13 + $0xa0] sm:$0xff]  ;;  %v248_v41 = vld [vmem:[%s1038_s13 + $0xa8] sm:$0xff]  ;;  %v249_v44 = vld [vmem:[%s1038_s13 + $0xb0] sm:$0xff] }
  0x1e   : > { %v261_v42 = vpack.c.bf16 %v248_v41, %v247_v40  ;;  %v250_v45 = vld [vmem:[%s1038_s13 + $0xb8] sm:$0xff]  ;;  %v1102_v46 = vld [vmem:[%s1211_s2] ss:$0 sm:$0xff]  ;;  %s216_s13 = sand.u32 1, %s938_s19   ;;  %p908_p3 = pnand %p907_p2, %p903_p13 }
  0x1f   : > { %v262_v47 = vpack.c.bf16 %v250_v45, %v249_v44  ;;  %s840_s25 = smul.u32 96, %s216_s13  ;;  %s611_s11 = scalar_lea.sflag [#allocation3], %s216_s13 }
  0x21   : > { %496 = vmatpush.bf16.msra.mxu1 %v754_v25  ;;  %835 = vmatpush.bf16.msra.mxu2 %v754_v25  ;;  %s1135_s26 = scalar_lea.vmem [#allocation2], %s840_s25 }
  0x22   : > { %s623_s9 = sshll.u32 %s1135_s26, 4  ;;  %s624_s9 = int_to_ptr.vmem [resolvable:$true] %s623_s9 }
  0x25   : > { %497 = vmatpush.bf16.msra.mxu1 %v753_v32  ;;  %836 = vmatpush.bf16.msra.mxu2 %v753_v32 }
  0x29   : > { %498 = vmatpush.bf16.msra.mxu1 %v752_v34  ;;  %837 = vmatpush.bf16.msra.mxu2 %v752_v34 }
  0x2b   : > { %702 = vmatmul.msk.bf16.gmra.mxu0 %vm283_vm0, %v252_v7 }
  0x2c   : > { %709 = vmatmul.msk.bf16.gmra.mxu3 %vm283_vm0, %v259_v29 }
  0x2d   : > { %499 = vmatpush.bf16.msra.mxu1 %v751_v38  ;;  %838 = vmatpush.bf16.msra.mxu2 %v751_v38 }
  0x31   : > { %500 = vmatpush.bf16.msra.mxu1 %v750_v39  ;;  %839 = vmatpush.bf16.msra.mxu2 %v750_v39 }
  0x3b   : > { %703 = vmatmul.msk.bf16.gmra.mxu0 %vm283_vm0, %v253_v10 }
  0x3c   : > { %710 = vmatmul.msk.bf16.gmra.mxu3 %vm283_vm0, %v260_v37 }
  0x4b   : > { %704 = vmatmul.msk.bf16.gmra.mxu0 %vm283_vm0, %v254_v13 }
  0x4c   : > { %711 = vmatmul.msk.bf16.gmra.mxu3 %vm283_vm0, %v261_v42 }
  0x5b   : > { %705 = vmatmul.msk.bf16.gmra.mxu0 %vm283_vm0, %v255_v16 }
  0x5c   : > { %712 = vmatmul.msk.bf16.gmra.mxu3 %vm283_vm0, %v262_v47 }
  0x6b   : > { %706 = vmatmul.msk.bf16.gmra.mxu0 %vm283_vm0, %v256_v28 }
  0x7b   : > { %707 = vmatmul.msk.bf16.gmra.mxu0 %vm283_vm0, %v257_v33 }
  0x98   : > { %v329_v43 = vpop.f32.mrf.mxu0 }
  0x99   : > { %v330_v48 = vadd.f32 %v1102_v46, %v329_v43 }
  0x9b   : > { %v389_v51 = vmax.f32 %v330_v48, 0.0 }
  0x9f   : > { %v364_v21 = vpop.f32.mrf.mxu3 }
  0xa0   : > { %v331_v49 = vpop.f32.mrf.mxu0  ;;  %v365_v35 = vadd.f32 %v1102_v46, %v364_v21 }
  0xa1   : > { %v332_v50 = vadd.f32 %v1102_v46, %v331_v49 }
  0xa2   : > { %v403_v38 = vmax.f32 %v365_v35, 0.0 }
  0xa3   : > { %v390_v52 = vmax.f32 %v332_v50, 0.0  ;;  %v1127_v50 = vld [vmem:[%s1213_s4] ss:$0 sm:$0xff] }
  0xa5   : > { %v413_v53 = vpack.c.bf16 %v390_v52, %v389_v51 }
  0xa7   : > { %501 = vmatmul.bf16.vlgmr.msra.gmra.mxu1 %v413_v53  ;;  %v366_v27 = vpop.f32.mrf.mxu3 }
  0xa8   : > { %v334_v54 = vpop.f32.mrf.mxu0  ;;  %v367_v36 = vadd.f32 %v1102_v46, %v366_v27 }
  0xa9   : > { %v335_v55 = vadd.f32 %v1102_v46, %v334_v54 }
  0xaa   : > { %v404_v39 = vmax.f32 %v367_v36, 0.0 }
  0xab   : > { %v391_v58 = vmax.f32 %v335_v55, 0.0 }
  0xac   : > { %v420_v40 = vpack.c.bf16 %v404_v39, %v403_v38 }
  0xaf   : > { %v369_v33 = vpop.f32.mrf.mxu3 }
  0xb0   : > { %v336_v56 = vpop.f32.mrf.mxu0  ;;  %v370_v42 = vadd.f32 %v1102_v46, %v369_v33 }
  0xb1   : > { %v337_v57 = vadd.f32 %v1102_v46, %v336_v56 }
  0xb2   : > { %v405_v44 = vmax.f32 %v370_v42, 0.0 }
  0xb3   : > { %v392_v59 = vmax.f32 %v337_v57, 0.0 }
  0xb5   : > { %v414_v60 = vpack.c.bf16 %v392_v59, %v391_v58 }
  0xb7   : > { %506 = vmatmul.bf16.gmra.mxu1 %v414_v60  ;;  %v371_v37 = vpop.f32.mrf.mxu3 }
  0xb8   : > { %v339_v61 = vpop.f32.mrf.mxu0  ;;  %v372_v43 = vadd.f32 %v1102_v46, %v371_v37 }
  0xb9   : > { %v340_v62 = vadd.f32 %v1102_v46, %v339_v61 }
  0xba   : > { %v406_v45 = vmax.f32 %v372_v43, 0.0 }
  0xbb   : > { %v393_v1 = vmax.f32 %v340_v62, 0.0 }
  0xbc   : > { %v421_v49 = vpack.c.bf16 %v406_v45, %v405_v44 }
  0xbf   : > { %v374_v41 = vpop.f32.mrf.mxu3 }
  0xc0   : > { %v341_v63 = vpop.f32.mrf.mxu0  ;;  %v375_v53 = vadd.f32 %v1102_v46, %v374_v41 }
  0xc1   : > { %v342_v0 = vadd.f32 %v1102_v46, %v341_v63 }
  0xc2   : > { %v407_v58 = vmax.f32 %v375_v53, 0.0 }
  0xc3   : > { %v394_v2 = vmax.f32 %v342_v0, 0.0 }
  0xc5   : > { %v415_v3 = vpack.c.bf16 %v394_v2, %v393_v1 }
  0xc7   : > { %511 = vmatmul.bf16.gmra.mxu1 %v415_v3  ;;  %v376_v47 = vpop.f32.mrf.mxu3 }
  0xc8   : > { %v344_v4 = vpop.f32.mrf.mxu0  ;;  %v377_v55 = vadd.f32 %v1102_v46, %v376_v47 }
  0xc9   : > { %v345_v5 = vadd.f32 %v1102_v46, %v344_v4 }
  0xca   : > { %v408_v59 = vmax.f32 %v377_v55, 0.0 }
  0xcb   : > { %v395_v8 = vmax.f32 %v345_v5, 0.0 }
  0xcc   : > { %v422_v61 = vpack.c.bf16 %v408_v59, %v407_v58 }
  0xcf   : > { %v379_v52 = vpop.f32.mrf.mxu3 }
  0xd0   : > { %v346_v6 = vpop.f32.mrf.mxu0  ;;  %v380_v0 = vadd.f32 %v1102_v46, %v379_v52 }
  0xd1   : > { %v347_v7 = vadd.f32 %v1102_v46, %v346_v6 }
  0xd2   : > { %v409_v6 = vmax.f32 %v380_v0, 0.0 }
  0xd3   : > { %v396_v9 = vmax.f32 %v347_v7, 0.0 }
  0xd5   : > { %v416_v10 = vpack.c.bf16 %v396_v9, %v395_v8 }
  0xd7   : > { %516 = vmatmul.bf16.gmra.mxu1 %v416_v10  ;;  %v381_v62 = vpop.f32.mrf.mxu3 }
  0xd8   : > { %v349_v11 = vpop.f32.mrf.mxu0  ;;  %v382_v2 = vadd.f32 %v1102_v46, %v381_v62 }
  0xd9   : > { %v350_v12 = vadd.f32 %v1102_v46, %v349_v11 }
  0xda   : > { %v410_v7 = vmax.f32 %v382_v2, 0.0 }
  0xdb   : > { %v397_v15 = vmax.f32 %v350_v12, 0.0 }
  0xdc   : > { %v423_v9 = vpack.c.bf16 %v410_v7, %v409_v6 }
  0xdf   : > { %v384_v5 = vpop.f32.mrf.mxu3 }
  0xe0   : > { %v351_v13 = vpop.f32.mrf.mxu0  ;;  %v385_v12 = vadd.f32 %v1102_v46, %v384_v5 }
  0xe1   : > { %v352_v14 = vadd.f32 %v1102_v46, %v351_v13 }
  0xe3   : > { %v398_v16 = vmax.f32 %v352_v14, 0.0 }
  0xe5   : > { %v417_v17 = vpack.c.bf16 %v398_v16, %v397_v15 }
  0xe7   : > { %521 = vmatmul.bf16.gmra.mxu1 %v417_v17  ;;  %v386_v10 = vpop.f32.mrf.mxu3  ;;  %v411_v17 = vmax.f32 %v385_v12, 0.0 }
  0xe8   : > { %v354_v18 = vpop.f32.mrf.mxu0  ;;  %v387_v14 = vadd.f32 %v1102_v46, %v386_v10 }
  0xe9   : > { %v355_v19 = vadd.f32 %v1102_v46, %v354_v18 }
  0xea   : > { %v412_v18 = vmax.f32 %v387_v14, 0.0 }
  0xeb   : > { %v399_v23 = vmax.f32 %v355_v19, 0.0 }
  0xf0   : > { %v356_v20 = vpop.f32.mrf.mxu0 }
  0xf1   : > { %v357_v22 = vadd.f32 %v1102_v46, %v356_v20  ;;  %v424_v20 = vpack.c.bf16 %v412_v18, %v411_v17 }
  0xf3   : > { %v400_v24 = vmax.f32 %v357_v22, 0.0 }
  0xf5   : > { %v418_v25 = vpack.c.bf16 %v400_v24, %v399_v23 }
  0xf7   : > { %526 = vmatmul.bf16.gmra.mxu1 %v418_v25 }
  0xf8   : > { %v359_v26 = vpop.f32.mrf.mxu0 }
  0xf9   : > { %v360_v28 = vadd.f32 %v1102_v46, %v359_v26 }
  0xfb   : > { %v401_v31 = vmax.f32 %v360_v28, 0.0 }
 0x100   : > { %v361_v29 = vpop.f32.mrf.mxu0 }
 0x101   : > { %v362_v30 = vadd.f32 %v1102_v46, %v361_v29 }
 0x103   : > { %v402_v32 = vmax.f32 %v362_v30, 0.0 }
 0x105   : > { %v419_v34 = vpack.c.bf16 %v402_v32, %v401_v31 }
 0x107   : > { %531 = vmatmul.bf16.vlgmr.msra.gmra.mxu2 %v419_v34 }
 0x117   : > { %536 = vmatmul.bf16.gmra.mxu2 %v420_v40 }
 0x124   : > { %v502_v48 = vpop.f32.mrf.mxu1 }
 0x125   : > { %v503_v54 = vadd.f32 %v1127_v50, %v502_v48 }
 0x127   : > { %541 = vmatmul.bf16.gmra.mxu2 %v421_v49 }
 0x12c   : > { %v504_v51 = vpop.f32.mrf.mxu1 }
 0x12d   : > { %v505_v56 = vadd.f32 %v1127_v50, %v504_v51 }
 0x12f   : > { %v762_v57 = vpack.c.bf16 %v505_v56, %v503_v54 }
 0x131   : > { %763 = vst [vmem:[%s1135_s26] sm:$0xff] %v762_v57  }
 0x134   : > { %v507_v60 = vpop.f32.mrf.mxu1 }
 0x135   : > { %v508_v1 = vadd.f32 %v1127_v50, %v507_v60 }
 0x137   : > { %546 = vmatmul.bf16.gmra.mxu2 %v422_v61 }
 0x13c   : > { %v509_v63 = vpop.f32.mrf.mxu1 }
 0x13d   : > { %v510_v3 = vadd.f32 %v1127_v50, %v509_v63 }
 0x13f   : > { %v767_v4 = vpack.c.bf16 %v510_v3, %v508_v1 }
 0x141   : > { %819 = vst [vmem:[%s1135_s26 + $0x8] sm:$0xff] %v767_v4  }
 0x144   : > { %v512_v8 = vpop.f32.mrf.mxu1 }
 0x145   : > { %v513_v13 = vadd.f32 %v1127_v50, %v512_v8 }
 0x147   : > { %551 = vmatmul.bf16.gmra.mxu2 %v423_v9 }
 0x14c   : > { %v514_v11 = vpop.f32.mrf.mxu1 }
 0x14d   : > { %v515_v15 = vadd.f32 %v1127_v50, %v514_v11 }
 0x14f   : > { %v772_v16 = vpack.c.bf16 %v515_v15, %v513_v13 }
 0x151   : > { %820 = vst [vmem:[%s1135_s26 + $0x10] sm:$0xff] %v772_v16  }
 0x154   : > { %v517_v19 = vpop.f32.mrf.mxu1 }
 0x155   : > { %v518_v22 = vadd.f32 %v1127_v50, %v517_v19 }
 0x157   : > { %556 = vmatmul.bf16.gmra.mxu2 %v424_v20 }
 0x15c   : > { %v519_v21 = vpop.f32.mrf.mxu1 }
 0x15d   : > { %v520_v23 = vadd.f32 %v1127_v50, %v519_v21 }
 0x15f   : > { %v777_v24 = vpack.c.bf16 %v520_v23, %v518_v22 }
 0x161   : > { %821 = vst [vmem:[%s1135_s26 + $0x18] sm:$0xff] %v777_v24  }
 0x164   : > { %v522_v25 = vpop.f32.mrf.mxu1 }
 0x165   : > { %v523_v26 = vadd.f32 %v1127_v50, %v522_v25 }
 0x16c   : > { %v524_v46 = vpop.f32.mrf.mxu1 }
 0x16d   : > { %v525_v27 = vadd.f32 %v1127_v50, %v524_v46 }
 0x16f   : > { %v782_v28 = vpack.c.bf16 %v525_v27, %v523_v26 }
 0x171   : > { %822 = vst [vmem:[%s1135_s26 + $0x20] sm:$0xff] %v782_v28  }
 0x174   : > { %v527_v29 = vpop.f32.mrf.mxu1 }
 0x175   : > { %v528_v31 = vadd.f32 %v1127_v50, %v527_v29 }
 0x17c   : > { %v529_v30 = vpop.f32.mrf.mxu1 }
 0x17d   : > { %v530_v32 = vadd.f32 %v1127_v50, %v529_v30 }
 0x17f   : > { %v787_v33 = vpack.c.bf16 %v530_v32, %v528_v31 }
 0x181   : > { %823 = vst [vmem:[%s1135_s26 + $0x28] sm:$0xff] %v787_v33  }
 0x18a   : > { %v532_v34 = vpop.f32.mrf.mxu2 }
 0x18b   : > { %v533_v36 = vadd.f32 %v1127_v50, %v532_v34 }
 0x192   : > { %v534_v35 = vpop.f32.mrf.mxu2 }
 0x193   : > { %v535_v37 = vadd.f32 %v1127_v50, %v534_v35 }
 0x195   : > { %v792_v38 = vpack.c.bf16 %v535_v37, %v533_v36 }
 0x197   : > { %824 = vst [vmem:[%s1135_s26 + $0x30] sm:$0xff] %v792_v38  }
 0x19a   : > { %v537_v39 = vpop.f32.mrf.mxu2 }
 0x19b   : > { %v538_v41 = vadd.f32 %v1127_v50, %v537_v39 }
 0x1a2   : > { %v539_v40 = vpop.f32.mrf.mxu2 }
 0x1a3   : > { %v540_v42 = vadd.f32 %v1127_v50, %v539_v40 }
 0x1a5   : > { %v797_v43 = vpack.c.bf16 %v540_v42, %v538_v41 }
 0x1a7   : > { %825 = vst [vmem:[%s1135_s26 + $0x38] sm:$0xff] %v797_v43  }
 0x1aa   : > { %v542_v44 = vpop.f32.mrf.mxu2 }
 0x1ab   : > { %v543_v47 = vadd.f32 %v1127_v50, %v542_v44 }
 0x1b2   : > { %v544_v45 = vpop.f32.mrf.mxu2 }
 0x1b3   : > { %v545_v48 = vadd.f32 %v1127_v50, %v544_v45 }
 0x1b5   : > { %v802_v49 = vpack.c.bf16 %v545_v48, %v543_v47 }
 0x1b7   : > { %826 = vst [vmem:[%s1135_s26 + $0x40] sm:$0xff] %v802_v49  }
 0x1ba   : > { %v547_v51 = vpop.f32.mrf.mxu2 }
 0x1bb   : > { %v548_v53 = vadd.f32 %v1127_v50, %v547_v51 }
 0x1c2   : > { %v549_v52 = vpop.f32.mrf.mxu2 }
 0x1c3   : > { %v550_v54 = vadd.f32 %v1127_v50, %v549_v52 }
 0x1c5   : > { %v807_v55 = vpack.c.bf16 %v550_v54, %v548_v53 }
 0x1c7   : > { %827 = vst [vmem:[%s1135_s26 + $0x48] sm:$0xff] %v807_v55  }
 0x1ca   : > { %v552_v56 = vpop.f32.mrf.mxu2 }
 0x1cb   : > { %v553_v58 = vadd.f32 %v1127_v50, %v552_v56 }
 0x1d2   : > { %v554_v57 = vpop.f32.mrf.mxu2 }
 0x1d3   : > { %v555_v59 = vadd.f32 %v1127_v50, %v554_v57 }
 0x1d5   : > { %v812_v60 = vpack.c.bf16 %v555_v59, %v553_v58 }
 0x1d7   : > { %828 = vst [vmem:[%s1135_s26 + $0x50] sm:$0xff] %v812_v60  }
 0x1da   : > { %v557_v61 = vpop.f32.mrf.mxu2 }
 0x1db   : > { %v558_v63 = vadd.f32 %v1127_v50, %v557_v61 }
 0x1e2   : > { %v559_v62 = vpop.f32.mrf.mxu2 }
 0x1e3   : > { %v560_v0 = vadd.f32 %v1127_v50, %v559_v62 }
 0x1e5   : > { %v817_v1 = vpack.c.bf16 %v560_v0, %v558_v63 }
 0x1e7   : > { %829 = vst [vmem:[%s1135_s26 + $0x58] sm:$0xff] %v817_v1  }
 0x1e8   : > { %911 = shalt.err (!%p908_p3)
}
 0x1e9   : > { %s948_s13 = smov 64   ;;  %s949_s25 = smov 4  }
 0x1ea   : > { %841 = dma.vmem_to_hbm [thread:$0]  (%p1018_p5), %s624_s9, 1536, %s626_s10, %s611_s11, %s948_s13, %s948_s13, %s949_s25  }
 0x1eb PF: > { %p847_p4 = scmp.ge.s32.totalorder %s946_s21, 2  ;;  %s640_s26 = sand.u32 1, %s934_s18  }
 0x1ec   : > { %s641_s30 = scalar_lea.sflag [#allocation3], %s640_s26 }
 0x1ed   : > { %p844_p7 = pnand %p847_p4, %p1022_p6 }
 0x1ef   : > { %p845_p8 = pneg %p844_p7 }
 0x1f1   : > { %929 = dma.done.wait (%p845_p8), %s641_s30, 1536  }
 0x1f2   : > { %931 = vsyncadd (%p845_p8), %s641_s30, 4294965760  ;;  %p15_p9 = scmp.ge.s32.totalorder %s1005_s24, 4   ;;  %s1217_s18 = smov %s938_s19 }
 0x1f3   : > { %s1218_s19 = smov %s942_s20  ;;  %s1219_s20 = smov %s1016_s27 }
 0x1f4   : > { %s1220_s21 = smov %s1005_s24  ;;  %17 = sbr.rel (!%p15_p9) target bundleno = 3 (0x3), region = 75 }
 0x1f9   :  { %647 = vsyncpa [#allocation3], 1 }
 0x1fa   :  { %649 = vsyncpa [#allocation3 + $0x1], 1 }

// kernel: tpu_custom_call.1
= control target key start
LH: loop header
LB: loop body
LE: loop exit
PB: predicated region body
PF: predicated region fallthrough
CT: control target
= control target key end

     0   :  { %10 = vsyncpa [#allocation3], 0  ;;  %s1209_s0 = inlined_call_operand.vmem [shape: f32[384,32], index: 0, kind: input, shape index: {}]   ;;  %s1210_s1 = inlined_call_operand.vmem [shape: bf16[32,128], index: 1, kind: input, shape index: {}]   ;;  %s1211_s2 = inlined_call_operand.vmem [shape: f32[1,128], index: 2, kind: input, shape index: {}]   ;;  %s1212_s3 = inlined_call_operand.vmem [shape: bf16[128,128], index: 3, kind: input, shape index: {}]   ;;  %s1213_s4 = inlined_call_operand.vmem [shape: f32[1,128], index: 4, kind: input, shape index: {}]   ;;  %s1214_s5 = inlined_call_operand.hbm [shape: bf16[384,128], index: 5, kind: output, shape index: {}]  }
   0x1   :  { %12 = vsyncpa [#allocation3 + $0x1], 0  ;;  %s980_s18 = smov 0   ;;  %s982_s19 = smov 0  }
   0x2   :  { %s984_s20 = smov 0   ;;  %s986_s21 = smov 0  }
   0x3 LB: > { %s1001_s22 = sadd.s32 4294967295, %s946_s21   ;;  %s688_s23 = sadd.s32 4294967294, %s946_s21   ;;  %s946_s21 = sphi %s986_s21, %s1220_s21   ;;  %s942_s20 = sphi %s984_s20, %s1219_s20   ;;  %s938_s19 = sphi %s982_s19, %s1218_s19   ;;  %s934_s18 = sphi %s980_s18, %s1217_s18  }
   0x4   : > { %s1005_s24 = sadd.s32 1, %s946_s21   ;;  %s135_s25 = sadd.s32 1, %s942_s20 }
   0x5   : > { %s132_s26 = ssub.s32 %s946_s21, %s1005_s24  ;;  %p145_p0 = scmp.ne.s32.totalorder %s942_s20, %s938_s19 }
   0x6   : > { %p133_p1 = scmp.eq.s32.totalorder %s132_s26, 0  ;;  %p146_p2 = scmp.eq.s32.totalorder %s1001_s22, 1 }
   0x7   : > { %p151_p3 = scmp.ne.s32.totalorder %s938_s19, %s934_s18  ;;  %p152_p4 = scmp.eq.s32.totalorder %s688_s23, 1 }
   0x8   : > { %s1016_s27 = scalar_select %p133_p1, %s942_s20, %s135_s25  }
   0x9   : > { %p1018_p5 = por %p146_p2, %p145_p0  ;;  %p1022_p6 = por %p152_p4, %p151_p3 }
   0xa   : > { %p691_p7 = scmp.ge.s32.totalorder %s946_s21, 1  ;;  %p191_p8 = scmp.lt.s32.totalorder %s946_s21, 3 }
   0xc   : > { %p192_p9 = pnand %p691_p7, %p191_p8 }
   0xd   : > { %s219_s7 = smul.u32 (!%p192_p9), 24, %s1001_s22  ;;  %s904_s16 = scalar_lea.hbm (!%p192_p9), %s1214_s5, 192 }
   0xe   : > { %195 = sbr.rel (%p192_p9) target bundleno = 491 (0x1eb), region = 40 }
   0xf   : > { %p220_p10 = scmp.lt.s32.totalorder (!%p192_p9), %s219_s7, 47  ;;  %s758_s30 = smul.u32 (!%p192_p9), 96, %s1001_s22 }
  0x11   : > { %s622_s8 = scalar_lea.hbm (!%p192_p9), %s1214_s5, %s758_s30 }
  0x13   : > { %v749_v0 = vld [vmem:[%s1210_s1 + $0x8] sm:$0xff]  ;;  %v748_v1 = vld [vmem:[%s1210_s1] sm:$0xff]  ;;  %s1222_s7 = smov (!%p220_p10, %s219_s7), 47  ;;  %vm283_vm0 = vcmask 261120   ;;  %v757_v20 = vld [vmem:[%s1212_s3 + $0x38] sm:$0xff] }
  0x14   : > { %326 = vmatpush.bf16.msra.mxu0 %v749_v0  ;;  %830 = vmatpush.bf16.msra.mxu3 %v749_v0  ;;  %s692_s10 = sshll.u32 %s1222_s7, 3  ;;  %v756_v21 = vld [vmem:[%s1212_s3 + $0x30] sm:$0xff]  ;;  %v755_v22 = vld [vmem:[%s1212_s3 + $0x28] sm:$0xff]  ;;  %v754_v25 = vld [vmem:[%s1212_s3 + $0x20] sm:$0xff] }
  0x15   : > { %s1038_s13 = scalar_lea.vmem %s1209_s0, %s692_s10  ;;  %493 = vmatpush.bf16.msra.mxu1 %v757_v20  ;;  %832 = vmatpush.bf16.msra.mxu2 %v757_v20  ;;  %v753_v32 = vld [vmem:[%s1212_s3 + $0x18] sm:$0xff]  ;;  %v752_v34 = vld [vmem:[%s1212_s3 + $0x10] sm:$0xff]  ;;  %v751_v38 = vld [vmem:[%s1212_s3 + $0x8] sm:$0xff]  ;;  %s625_s10 = sshll.u32 %s622_s8, 4  ;;  %s626_s10 = int_to_ptr.hbm [resolvable:$true] %s625_s10 }
  0x16   : > { %v227_v2 = vld [vmem:[%s1038_s13] sm:$0xff]  ;;  %v228_v3 = vld [vmem:[%s1038_s13 + $0x8] sm:$0xff]  ;;  %v229_v5 = vld [vmem:[%s1038_s13 + $0x10] sm:$0xff]  ;;  %s898_s12 = sshra.s32 %s626_s10, 4  ;;  %s899_s12 = int_to_ptr.hbm [resolvable:$true] %s898_s12 }
  0x17   : > { %v251_v4 = vpack.c.bf16 %v228_v3, %v227_v2  ;;  %v230_v6 = vld [vmem:[%s1038_s13 + $0x18] sm:$0xff]  ;;  %v231_v8 = vld [vmem:[%s1038_s13 + $0x20] sm:$0xff]  ;;  %v232_v9 = vld [vmem:[%s1038_s13 + $0x28] sm:$0xff]  ;;  %s900_s22 = scalar_lea.hbm %s899_s12, 96  ;;  %p905_p0 = scmp.lt.s32.totalorder %s899_s12, %s1214_s5 }
  0x18   : > { %327 = vmatpush.bf16.msra.mxu0 %v748_v1  ;;  %831 = vmatpush.bf16.msra.mxu3 %v748_v1  ;;  %v252_v7 = vpack.c.bf16 %v230_v6, %v229_v5  ;;  %v253_v10 = vpack.c.bf16 %v232_v9, %v231_v8  ;;  %v233_v11 = vld [vmem:[%s1038_s13 + $0x30] sm:$0xff]  ;;  %v234_v12 = vld [vmem:[%s1038_s13 + $0x38] sm:$0xff]  ;;  %v235_v14 = vld [vmem:[%s1038_s13 + $0x40] sm:$0xff]  ;;  %p901_p11 = scmp.ne.s32.totalorder %s899_s12, %s900_s22  ;;  %p906_p1 = scmp.lt.s32.totalorder %s904_s16, %s900_s22 }
  0x19   : > { %v254_v13 = vpack.c.bf16 %v234_v12, %v233_v11  ;;  %v236_v15 = vld [vmem:[%s1038_s13 + $0x48] sm:$0xff]  ;;  %v241_v17 = vld [vmem:[%s1038_s13 + $0x70] sm:$0xff]  ;;  %v242_v18 = vld [vmem:[%s1038_s13 + $0x78] sm:$0xff]  ;;  %494 = vmatpush.bf16.msra.mxu1 %v756_v21  ;;  %833 = vmatpush.bf16.msra.mxu2 %v756_v21 }
  0x1a   : > { %v255_v16 = vpack.c.bf16 %v236_v15, %v235_v14  ;;  %v258_v19 = vpack.c.bf16 %v242_v18, %v241_v17  ;;  %v237_v23 = vld [vmem:[%s1038_s13 + $0x50] sm:$0xff]  ;;  %v238_v24 = vld [vmem:[%s1038_s13 + $0x58] sm:$0xff]  ;;  %v243_v26 = vld [vmem:[%s1038_s13 + $0x80] sm:$0xff]  ;;  %p902_p12 = pnand %p901_p11, %p1018_p5  ;;  %p907_p2 = por %p906_p1, %p905_p0 }
  0x1b   : > { %701 = vmatmul.msk.bf16.vlgmr.msra.gmra.mxu0 %vm283_vm0, %v251_v4  ;;  %v244_v27 = vld [vmem:[%s1038_s13 + $0x88] sm:$0xff]  ;;  %v256_v28 = vpack.c.bf16 %v238_v24, %v237_v23  ;;  %v239_v30 = vld [vmem:[%s1038_s13 + $0x60] sm:$0xff]  ;;  %v245_v35 = vld [vmem:[%s1038_s13 + $0x90] sm:$0xff] }
  0x1c   : > { %708 = vmatmul.msk.bf16.vlgmr.msra.gmra.mxu3 %vm283_vm0, %v258_v19  ;;  %v259_v29 = vpack.c.bf16 %v244_v27, %v243_v26  ;;  %v240_v31 = vld [vmem:[%s1038_s13 + $0x68] sm:$0xff]  ;;  %v246_v36 = vld [vmem:[%s1038_s13 + $0x98] sm:$0xff]  ;;  %v750_v39 = vld [vmem:[%s1212_s3] sm:$0xff]  ;;  %p903_p13 = pneg %p902_p12 }
  0x1d   : > { %495 = vmatpush.bf16.msra.mxu1 %v755_v22  ;;  %834 = vmatpush.bf16.msra.mxu2 %v755_v22  ;;  %v257_v33 = vpack.c.bf16 %v240_v31, %v239_v30  ;;  %v260_v37 = vpack.c.bf16 %v246_v36, %v245_v35  ;;  %v247_v40 = vld [vmem:[%s1038_s13 + $0xa0] sm:$0xff]  ;;  %v248_v41 = vld [vmem:[%s1038_s13 + $0xa8] sm:$0xff]  ;;  %v249_v44 = vld [vmem:[%s1038_s13 + $0xb0] sm:$0xff] }
  0x1e   : > { %v261_v42 = vpack.c.bf16 %v248_v41, %v247_v40  ;;  %v250_v45 = vld [vmem:[%s1038_s13 + $0xb8] sm:$0xff]  ;;  %v1102_v46 = vld [vmem:[%s1211_s2] ss:$0 sm:$0xff]  ;;  %s216_s13 = sand.u32 1, %s938_s19   ;;  %p908_p3 = pnand %p907_p2, %p903_p13 }
  0x1f   : > { %v262_v47 = vpack.c.bf16 %v250_v45, %v249_v44  ;;  %s840_s25 = smul.u32 96, %s216_s13  ;;  %s611_s11 = scalar_lea.sflag [#allocation3], %s216_s13 }
  0x21   : > { %496 = vmatpush.bf16.msra.mxu1 %v754_v25  ;;  %835 = vmatpush.bf16.msra.mxu2 %v754_v25  ;;  %s1135_s26 = scalar_lea.vmem [#allocation2], %s840_s25 }
  0x22   : > { %s623_s9 = sshll.u32 %s1135_s26, 4  ;;  %s624_s9 = int_to_ptr.vmem [resolvable:$true] %s623_s9 }
  0x25   : > { %497 = vmatpush.bf16.msra.mxu1 %v753_v32  ;;  %836 = vmatpush.bf16.msra.mxu2 %v753_v32 }
  0x29   : > { %498 = vmatpush.bf16.msra.mxu1 %v752_v34  ;;  %837 = vmatpush.bf16.msra.mxu2 %v752_v34 }
  0x2b   : > { %702 = vmatmul.msk.bf16.gmra.mxu0 %vm283_vm0, %v252_v7 }
  0x2c   : > { %709 = vmatmul.msk.bf16.gmra.mxu3 %vm283_vm0, %v259_v29 }
  0x2d   : > { %499 = vmatpush.bf16.msra.mxu1 %v751_v38  ;;  %838 = vmatpush.bf16.msra.mxu2 %v751_v38 }
  0x31   : > { %500 = vmatpush.bf16.msra.mxu1 %v750_v39  ;;  %839 = vmatpush.bf16.msra.mxu2 %v750_v39 }
  0x3b   : > { %703 = vmatmul.msk.bf16.gmra.mxu0 %vm283_vm0, %v253_v10 }
  0x3c   : > { %710 = vmatmul.msk.bf16.gmra.mxu3 %vm283_vm0, %v260_v37 }
  0x4b   : > { %704 = vmatmul.msk.bf16.gmra.mxu0 %vm283_vm0, %v254_v13 }
  0x4c   : > { %711 = vmatmul.msk.bf16.gmra.mxu3 %vm283_vm0, %v261_v42 }
  0x5b   : > { %705 = vmatmul.msk.bf16.gmra.mxu0 %vm283_vm0, %v255_v16 }
  0x5c   : > { %712 = vmatmul.msk.bf16.gmra.mxu3 %vm283_vm0, %v262_v47 }
  0x6b   : > { %706 = vmatmul.msk.bf16.gmra.mxu0 %vm283_vm0, %v256_v28 }
  0x7b   : > { %707 = vmatmul.msk.bf16.gmra.mxu0 %vm283_vm0, %v257_v33 }
  0x98   : > { %v329_v43 = vpop.f32.mrf.mxu0 }
  0x99   : > { %v330_v48 = vadd.f32 %v1102_v46, %v329_v43 }
  0x9b   : > { %v389_v51 = vmax.f32 %v330_v48, 0.0 }
  0x9f   : > { %v364_v21 = vpop.f32.mrf.mxu3 }
  0xa0   : > { %v331_v49 = vpop.f32.mrf.mxu0  ;;  %v365_v35 = vadd.f32 %v1102_v46, %v364_v21 }
  0xa1   : > { %v332_v50 = vadd.f32 %v1102_v46, %v331_v49 }
  0xa2   : > { %v403_v38 = vmax.f32 %v365_v35, 0.0 }
  0xa3   : > { %v390_v52 = vmax.f32 %v332_v50, 0.0  ;;  %v1127_v50 = vld [vmem:[%s1213_s4] ss:$0 sm:$0xff] }
  0xa5   : > { %v413_v53 = vpack.c.bf16 %v390_v52, %v389_v51 }
  0xa7   : > { %501 = vmatmul.bf16.vlgmr.msra.gmra.mxu1 %v413_v53  ;;  %v366_v27 = vpop.f32.mrf.mxu3 }
  0xa8   : > { %v334_v54 = vpop.f32.mrf.mxu0  ;;  %v367_v36 = vadd.f32 %v1102_v46, %v366_v27 }
  0xa9   : > { %v335_v55 = vadd.f32 %v1102_v46, %v334_v54 }
  0xaa   : > { %v404_v39 = vmax.f32 %v367_v36, 0.0 }
  0xab   : > { %v391_v58 = vmax.f32 %v335_v55, 0.0 }
  0xac   : > { %v420_v40 = vpack.c.bf16 %v404_v39, %v403_v38 }
  0xaf   : > { %v369_v33 = vpop.f32.mrf.mxu3 }
  0xb0   : > { %v336_v56 = vpop.f32.mrf.mxu0  ;;  %v370_v42 = vadd.f32 %v1102_v46, %v369_v33 }
  0xb1   : > { %v337_v57 = vadd.f32 %v1102_v46, %v336_v56 }
  0xb2   : > { %v405_v44 = vmax.f32 %v370_v42, 0.0 }
  0xb3   : > { %v392_v59 = vmax.f32 %v337_v57, 0.0 }
  0xb5   : > { %v414_v60 = vpack.c.bf16 %v392_v59, %v391_v58 }
  0xb7   : > { %506 = vmatmul.bf16.gmra.mxu1 %v414_v60  ;;  %v371_v37 = vpop.f32.mrf.mxu3 }
  0xb8   : > { %v339_v61 = vpop.f32.mrf.mxu0  ;;  %v372_v43 = vadd.f32 %v1102_v46, %v371_v37 }
  0xb9   : > { %v340_v62 = vadd.f32 %v1102_v46, %v339_v61 }
  0xba   : > { %v406_v45 = vmax.f32 %v372_v43, 0.0 }
  0xbb   : > { %v393_v1 = vmax.f32 %v340_v62, 0.0 }
  0xbc   : > { %v421_v49 = vpack.c.bf16 %v406_v45, %v405_v44 }
  0xbf   : > { %v374_v41 = vpop.f32.mrf.mxu3 }
  0xc0   : > { %v341_v63 = vpop.f32.mrf.mxu0  ;;  %v375_v53 = vadd.f32 %v1102_v46, %v374_v41 }
  0xc1   : > { %v342_v0 = vadd.f32 %v1102_v46, %v341_v63 }
  0xc2   : > { %v407_v58 = vmax.f32 %v375_v53, 0.0 }
  0xc3   : > { %v394_v2 = vmax.f32 %v342_v0, 0.0 }
  0xc5   : > { %v415_v3 = vpack.c.bf16 %v394_v2, %v393_v1 }
  0xc7   : > { %511 = vmatmul.bf16.gmra.mxu1 %v415_v3  ;;  %v376_v47 = vpop.f32.mrf.mxu3 }
  0xc8   : > { %v344_v4 = vpop.f32.mrf.mxu0  ;;  %v377_v55 = vadd.f32 %v1102_v46, %v376_v47 }
  0xc9   : > { %v345_v5 = vadd.f32 %v1102_v46, %v344_v4 }
  0xca   : > { %v408_v59 = vmax.f32 %v377_v55, 0.0 }
  0xcb   : > { %v395_v8 = vmax.f32 %v345_v5, 0.0 }
  0xcc   : > { %v422_v61 = vpack.c.bf16 %v408_v59, %v407_v58 }
  0xcf   : > { %v379_v52 = vpop.f32.mrf.mxu3 }
  0xd0   : > { %v346_v6 = vpop.f32.mrf.mxu0  ;;  %v380_v0 = vadd.f32 %v1102_v46, %v379_v52 }
  0xd1   : > { %v347_v7 = vadd.f32 %v1102_v46, %v346_v6 }
  0xd2   : > { %v409_v6 = vmax.f32 %v380_v0, 0.0 }
  0xd3   : > { %v396_v9 = vmax.f32 %v347_v7, 0.0 }
  0xd5   : > { %v416_v10 = vpack.c.bf16 %v396_v9, %v395_v8 }
  0xd7   : > { %516 = vmatmul.bf16.gmra.mxu1 %v416_v10  ;;  %v381_v62 = vpop.f32.mrf.mxu3 }
  0xd8   : > { %v349_v11 = vpop.f32.mrf.mxu0  ;;  %v382_v2 = vadd.f32 %v1102_v46, %v381_v62 }
  0xd9   : > { %v350_v12 = vadd.f32 %v1102_v46, %v349_v11 }
  0xda   : > { %v410_v7 = vmax.f32 %v382_v2, 0.0 }
  0xdb   : > { %v397_v15 = vmax.f32 %v350_v12, 0.0 }
  0xdc   : > { %v423_v9 = vpack.c.bf16 %v410_v7, %v409_v6 }
  0xdf   : > { %v384_v5 = vpop.f32.mrf.mxu3 }
  0xe0   : > { %v351_v13 = vpop.f32.mrf.mxu0  ;;  %v385_v12 = vadd.f32 %v1102_v46, %v384_v5 }
  0xe1   : > { %v352_v14 = vadd.f32 %v1102_v46, %v351_v13 }
  0xe3   : > { %v398_v16 = vmax.f32 %v352_v14, 0.0 }
  0xe5   : > { %v417_v17 = vpack.c.bf16 %v398_v16, %v397_v15 }
  0xe7   : > { %521 = vmatmul.bf16.gmra.mxu1 %v417_v17  ;;  %v386_v10 = vpop.f32.mrf.mxu3  ;;  %v411_v17 = vmax.f32 %v385_v12, 0.0 }
  0xe8   : > { %v354_v18 = vpop.f32.mrf.mxu0  ;;  %v387_v14 = vadd.f32 %v1102_v46, %v386_v10 }
  0xe9   : > { %v355_v19 = vadd.f32 %v1102_v46, %v354_v18 }
  0xea   : > { %v412_v18 = vmax.f32 %v387_v14, 0.0 }
  0xeb   : > { %v399_v23 = vmax.f32 %v355_v19, 0.0 }
  0xf0   : > { %v356_v20 = vpop.f32.mrf.mxu0 }
  0xf1   : > { %v357_v22 = vadd.f32 %v1102_v46, %v356_v20  ;;  %v424_v20 = vpack.c.bf16 %v412_v18, %v411_v17 }
  0xf3   : > { %v400_v24 = vmax.f32 %v357_v22, 0.0 }
  0xf5   : > { %v418_v25 = vpack.c.bf16 %v400_v24, %v399_v23 }
  0xf7   : > { %526 = vmatmul.bf16.gmra.mxu1 %v418_v25 }
  0xf8   : > { %v359_v26 = vpop.f32.mrf.mxu0 }
  0xf9   : > { %v360_v28 = vadd.f32 %v1102_v46, %v359_v26 }
  0xfb   : > { %v401_v31 = vmax.f32 %v360_v28, 0.0 }
 0x100   : > { %v361_v29 = vpop.f32.mrf.mxu0 }
 0x101   : > { %v362_v30 = vadd.f32 %v1102_v46, %v361_v29 }
 0x103   : > { %v402_v32 = vmax.f32 %v362_v30, 0.0 }
 0x105   : > { %v419_v34 = vpack.c.bf16 %v402_v32, %v401_v31 }
 0x107   : > { %531 = vmatmul.bf16.vlgmr.msra.gmra.mxu2 %v419_v34 }
 0x117   : > { %536 = vmatmul.bf16.gmra.mxu2 %v420_v40 }
 0x124   : > { %v502_v48 = vpop.f32.mrf.mxu1 }
 0x125   : > { %v503_v54 = vadd.f32 %v1127_v50, %v502_v48 }
 0x127   : > { %541 = vmatmul.bf16.gmra.mxu2 %v421_v49 }
 0x12c   : > { %v504_v51 = vpop.f32.mrf.mxu1 }
 0x12d   : > { %v505_v56 = vadd.f32 %v1127_v50, %v504_v51 }
 0x12f   : > { %v762_v57 = vpack.c.bf16 %v505_v56, %v503_v54 }
 0x131   : > { %763 = vst [vmem:[%s1135_s26] sm:$0xff] %v762_v57  }
 0x134   : > { %v507_v60 = vpop.f32.mrf.mxu1 }
 0x135   : > { %v508_v1 = vadd.f32 %v1127_v50, %v507_v60 }
 0x137   : > { %546 = vmatmul.bf16.gmra.mxu2 %v422_v61 }
 0x13c   : > { %v509_v63 = vpop.f32.mrf.mxu1 }
 0x13d   : > { %v510_v3 = vadd.f32 %v1127_v50, %v509_v63 }
 0x13f   : > { %v767_v4 = vpack.c.bf16 %v510_v3, %v508_v1 }
 0x141   : > { %819 = vst [vmem:[%s1135_s26 + $0x8] sm:$0xff] %v767_v4  }
 0x144   : > { %v512_v8 = vpop.f32.mrf.mxu1 }
 0x145   : > { %v513_v13 = vadd.f32 %v1127_v50, %v512_v8 }
 0x147   : > { %551 = vmatmul.bf16.gmra.mxu2 %v423_v9 }
 0x14c   : > { %v514_v11 = vpop.f32.mrf.mxu1 }
 0x14d   : > { %v515_v15 = vadd.f32 %v1127_v50, %v514_v11 }
 0x14f   : > { %v772_v16 = vpack.c.bf16 %v515_v15, %v513_v13 }
 0x151   : > { %820 = vst [vmem:[%s1135_s26 + $0x10] sm:$0xff] %v772_v16  }
 0x154   : > { %v517_v19 = vpop.f32.mrf.mxu1 }
 0x155   : > { %v518_v22 = vadd.f32 %v1127_v50, %v517_v19 }
 0x157   : > { %556 = vmatmul.bf16.gmra.mxu2 %v424_v20 }
 0x15c   : > { %v519_v21 = vpop.f32.mrf.mxu1 }
 0x15d   : > { %v520_v23 = vadd.f32 %v1127_v50, %v519_v21 }
 0x15f   : > { %v777_v24 = vpack.c.bf16 %v520_v23, %v518_v22 }
 0x161   : > { %821 = vst [vmem:[%s1135_s26 + $0x18] sm:$0xff] %v777_v24  }
 0x164   : > { %v522_v25 = vpop.f32.mrf.mxu1 }
 0x165   : > { %v523_v26 = vadd.f32 %v1127_v50, %v522_v25 }
 0x16c   : > { %v524_v46 = vpop.f32.mrf.mxu1 }
 0x16d   : > { %v525_v27 = vadd.f32 %v1127_v50, %v524_v46 }
 0x16f   : > { %v782_v28 = vpack.c.bf16 %v525_v27, %v523_v26 }
 0x171   : > { %822 = vst [vmem:[%s1135_s26 + $0x20] sm:$0xff] %v782_v28  }
 0x174   : > { %v527_v29 = vpop.f32.mrf.mxu1 }
 0x175   : > { %v528_v31 = vadd.f32 %v1127_v50, %v527_v29 }
 0x17c   : > { %v529_v30 = vpop.f32.mrf.mxu1 }
 0x17d   : > { %v530_v32 = vadd.f32 %v1127_v50, %v529_v30 }
 0x17f   : > { %v787_v33 = vpack.c.bf16 %v530_v32, %v528_v31 }
 0x181   : > { %823 = vst [vmem:[%s1135_s26 + $0x28] sm:$0xff] %v787_v33  }
 0x18a   : > { %v532_v34 = vpop.f32.mrf.mxu2 }
 0x18b   : > { %v533_v36 = vadd.f32 %v1127_v50, %v532_v34 }
 0x192   : > { %v534_v35 = vpop.f32.mrf.mxu2 }
 0x193   : > { %v535_v37 = vadd.f32 %v1127_v50, %v534_v35 }
 0x195   : > { %v792_v38 = vpack.c.bf16 %v535_v37, %v533_v36 }
 0x197   : > { %824 = vst [vmem:[%s1135_s26 + $0x30] sm:$0xff] %v792_v38  }
 0x19a   : > { %v537_v39 = vpop.f32.mrf.mxu2 }
 0x19b   : > { %v538_v41 = vadd.f32 %v1127_v50, %v537_v39 }
 0x1a2   : > { %v539_v40 = vpop.f32.mrf.mxu2 }
 0x1a3   : > { %v540_v42 = vadd.f32 %v1127_v50, %v539_v40 }
 0x1a5   : > { %v797_v43 = vpack.c.bf16 %v540_v42, %v538_v41 }
 0x1a7   : > { %825 = vst [vmem:[%s1135_s26 + $0x38] sm:$0xff] %v797_v43  }
 0x1aa   : > { %v542_v44 = vpop.f32.mrf.mxu2 }
 0x1ab   : > { %v543_v47 = vadd.f32 %v1127_v50, %v542_v44 }
 0x1b2   : > { %v544_v45 = vpop.f32.mrf.mxu2 }
 0x1b3   : > { %v545_v48 = vadd.f32 %v1127_v50, %v544_v45 }
 0x1b5   : > { %v802_v49 = vpack.c.bf16 %v545_v48, %v543_v47 }
 0x1b7   : > { %826 = vst [vmem:[%s1135_s26 + $0x40] sm:$0xff] %v802_v49  }
 0x1ba   : > { %v547_v51 = vpop.f32.mrf.mxu2 }
 0x1bb   : > { %v548_v53 = vadd.f32 %v1127_v50, %v547_v51 }
 0x1c2   : > { %v549_v52 = vpop.f32.mrf.mxu2 }
 0x1c3   : > { %v550_v54 = vadd.f32 %v1127_v50, %v549_v52 }
 0x1c5   : > { %v807_v55 = vpack.c.bf16 %v550_v54, %v548_v53 }
 0x1c7   : > { %827 = vst [vmem:[%s1135_s26 + $0x48] sm:$0xff] %v807_v55  }
 0x1ca   : > { %v552_v56 = vpop.f32.mrf.mxu2 }
 0x1cb   : > { %v553_v58 = vadd.f32 %v1127_v50, %v552_v56 }
 0x1d2   : > { %v554_v57 = vpop.f32.mrf.mxu2 }
 0x1d3   : > { %v555_v59 = vadd.f32 %v1127_v50, %v554_v57 }
 0x1d5   : > { %v812_v60 = vpack.c.bf16 %v555_v59, %v553_v58 }
 0x1d7   : > { %828 = vst [vmem:[%s1135_s26 + $0x50] sm:$0xff] %v812_v60  }
 0x1da   : > { %v557_v61 = vpop.f32.mrf.mxu2 }
 0x1db   : > { %v558_v63 = vadd.f32 %v1127_v50, %v557_v61 }
 0x1e2   : > { %v559_v62 = vpop.f32.mrf.mxu2 }
 0x1e3   : > { %v560_v0 = vadd.f32 %v1127_v50, %v559_v62 }
 0x1e5   : > { %v817_v1 = vpack.c.bf16 %v560_v0, %v558_v63 }
 0x1e7   : > { %829 = vst [vmem:[%s1135_s26 + $0x58] sm:$0xff] %v817_v1  }
 0x1e8   : > { %911 = shalt.err (!%p908_p3)
}
 0x1e9   : > { %s948_s13 = smov 64   ;;  %s949_s25 = smov 4  }
 0x1ea   : > { %841 = dma.vmem_to_hbm [thread:$0]  (%p1018_p5), %s624_s9, 1536, %s626_s10, %s611_s11, %s948_s13, %s948_s13, %s949_s25  }
 0x1eb PF: > { %p847_p4 = scmp.ge.s32.totalorder %s946_s21, 2  ;;  %s640_s26 = sand.u32 1, %s934_s18  }
 0x1ec   : > { %s641_s30 = scalar_lea.sflag [#allocation3], %s640_s26 }
 0x1ed   : > { %p844_p7 = pnand %p847_p4, %p1022_p6 }
 0x1ef   : > { %p845_p8 = pneg %p844_p7 }
 0x1f1   : > { %929 = dma.done.wait (%p845_p8), %s641_s30, 1536  }
 0x1f2   : > { %931 = vsyncadd (%p845_p8), %s641_s30, 4294965760  ;;  %p15_p9 = scmp.ge.s32.totalorder %s1005_s24, 4   ;;  %s1217_s18 = smov %s938_s19 }
 0x1f3   : > { %s1218_s19 = smov %s942_s20  ;;  %s1219_s20 = smov %s1016_s27 }
 0x1f4   : > { %s1220_s21 = smov %s1005_s24  ;;  %17 = sbr.rel (!%p15_p9) target bundleno = 3 (0x3), region = 75 }
 0x1f9   :  { %647 = vsyncpa [#allocation3], 1 }
 0x1fa   :  { %649 = vsyncpa [#allocation3 + $0x1], 1 }

</bundles_post_ra>
